<compile_context>
chip_gen: v5e
topology: v5e:2x2
jax: 0.10.0
libtpu: 0.0.40
codegen_flags: <defaults>
</compile_context>

<pallas_src>
import functools

import jax
import jax.numpy as jnp
from jax import lax
from jax.experimental import pallas as pl
from jax.experimental.pallas import tpu as pltpu


def _mihash_kernel(u_tile_ref, u_full_ref, lab_col_ref, lab_row_ref,
                   per_row_ref, histp_ref, histt_ref, *, nbins, delta):
    tm = u_tile_ref.shape[0]
    n, nbits = u_full_ref.shape
    i = pl.program_id(0)

    # --- affinity from labels (replaces y @ y.T and the 2-iota diag mask) ----
    same = lab_col_ref[...] == lab_row_ref[...]                     # (TM, N) bool
    col_ids = lax.broadcasted_iota(jnp.int32, (tm, n), 1)
    row_ids = i * tm + lax.broadcasted_iota(jnp.int32, (tm, 1), 0)
    xp = jnp.where(jnp.logical_and(same, col_ids != row_ids), 1.0, 0.0)

    inv_nm1 = jnp.float32(1.0 / (n - 1))
    prCp = jnp.sum(xp, axis=1, keepdims=True) * inv_nm1             # (TM, 1)
    prCn = 1.0 - prCp

    # --- relaxed hamming distance, pre-scaled by 1/delta ---------------------
    phi_t = 2.0 * jax.nn.sigmoid(u_tile_ref[...].astype(jnp.float32)) - 1.0
    phi_f = 2.0 * jax.nn.sigmoid(u_full_ref[...].astype(jnp.float32)) - 1.0
    gram = lax.dot_general(phi_t, phi_f, (((1,), (1,)), ((), ())),
                           preferred_element_type=jnp.float32)      # (TM, N)
    # dist = (nbits - gram) / 2 ;  scaled = dist / delta
    scaled = (jnp.float32(nbits) - gram) * jnp.float32(0.5 / delta)

    # --- per-bin triangular-pulse histograms (the VALU hot loop) -------------
    for b in range(nbins):
        pulse = jnp.maximum(1.0 - jnp.abs(scaled - jnp.float32(b)), 0.0)
        cp = jnp.sum(pulse * xp, axis=1, keepdims=True)             # (TM, 1)
        tot = jnp.sum(pulse, axis=1, keepdims=True)                 # (TM, 1)
        histp_ref[:, b:b + 1] = cp
        histt_ref[:, b:b + 1] = tot

    pDCp = histp_ref[...]                                           # (TM, nbins)
    pDtot = histt_ref[...]
    pDCn = pDtot - pDCp                                             # xn == 1 - xp

    # --- entropies, vectorized over the nbins lane axis ----------------------
    eps = jnp.float32(1e-7)
    sum_p = jnp.sum(pDCp, axis=1, keepdims=True)
    sum_n = jnp.sum(pDCn, axis=1, keepdims=True)
    # rows with zero mass are all-zero, so a safe denominator of 1 is exact.
    qp = pDCp * (1.0 / jnp.where(sum_p > 0, sum_p, 1.0))
    qn = pDCn * (1.0 / jnp.where(sum_n > 0, sum_n, 1.0))
    pD = pDtot * inv_nm1

    ent_D = -jnp.sum(pD * jnp.log(pD + eps), axis=1, keepdims=True)
    ent_Cp = -jnp.sum(qp * jnp.log(qp + eps), axis=1, keepdims=True)
    ent_Cn = -jnp.sum(qn * jnp.log(qn + eps), axis=1, keepdims=True)

    per_row_ref[...] = ent_D - (prCp * ent_Cp + prCn * ent_Cn)


def _pick_row_tile(n, max_tm=256):
    """Largest row tile <= max_tm that is a multiple of 8 and divides n."""
    if n <= max_tm:
        return n
    for tm in range(max_tm, 7, -1):
        if tm % 8 == 0 and n % tm == 0:
            return tm
    return n  # fall back to a single full tile (full-dim block is always legal)


def mihash_loss(u, y, nbins=16):
    """Pallas implementation of MIHashLoss.forward(u, y) -> scalar loss."""
    n, nbits = u.shape
    assert n > 1, "need at least two samples (division by N - 1)"
    if nbins == 0:
        nbins = nbits // 2
    delta = nbits // nbins
    assert delta >= 1, "nbins must not exceed nbit"

    # y is documented as one-hot, so integer labels are an exact substitute for
    # the (y @ y.T > 0) same-class test and avoid the tiny-K matmul.
    labels = jnp.argmax(y, axis=1).astype(jnp.int32)
    lab_col = labels.reshape(n, 1)
    lab_row = labels.reshape(1, n)

    tm = _pick_row_tile(n)
    num_tiles = n // tm

    kernel = functools.partial(_mihash_kernel, nbins=nbins, delta=delta)
    per_row = pl.pallas_call(
        kernel,
        grid=(num_tiles,),
        out_shape=jax.ShapeDtypeStruct((n, 1), jnp.float32),
        in_specs=[
            pl.BlockSpec((tm, nbits), lambda i: (i, 0)),   # u row tile
            pl.BlockSpec((n, nbits), lambda i: (0, 0)),    # u, resident
            pl.BlockSpec((tm, 1), lambda i: (i, 0)),       # labels column tile
            pl.BlockSpec((1, n), lambda i: (0, 0)),        # labels row, resident
        ],
        out_specs=pl.BlockSpec((tm, 1), lambda i: (i, 0)),
        scratch_shapes=[
            pltpu.VMEM((tm, nbins), jnp.float32),          # pDCp histogram
            pltpu.VMEM((tm, nbins), jnp.float32),          # pulse row-sum histogram
        ],
        compiler_params=pltpu.CompilerParams(
            dimension_semantics=("parallel",),
            vmem_limit_bytes=48 * 1024 * 1024,
        ),
    )(u, u, lab_col, lab_row)
    return jnp.sum(per_row)


def _mihash_loss_ref(u, y, nbins=16):
    """Pure-JAX reference mirroring the PyTorch module."""
    N, nbits = u.shape
    aff = (y @ y.T > 0).astype(jnp.float32)
    aff = aff * (1.0 - jnp.eye(N, dtype=jnp.float32))
    xp, xn = aff, 1.0 - aff
    phi = 2.0 * jax.nn.sigmoid(u) - 1.0
    dist = (nbits - phi @ phi.T) / 2.0
    prCp = jnp.sum(xp, axis=1) / (N - 1)
    prCn = 1.0 - prCp
    delta = nbits // nbins
    pDCp = jnp.zeros((N, nbins), jnp.float32)
    pDCn = jnp.zeros((N, nbins), jnp.float32)
    for b in range(nbins):
        mid = b * delta
        ind = ((mid - delta < dist) & (dist <= mid + delta)).astype(jnp.float32)
        pulse = (1.0 - jnp.abs(dist - mid) / delta) * ind
        pDCp = pDCp.at[:, b].set(jnp.sum(pulse * xp, axis=1))
        pDCn = pDCn.at[:, b].set(jnp.sum(pulse * xn, axis=1))
    pD = (pDCp + pDCn) / (N - 1)
    sp = jnp.sum(pDCp, axis=1, keepdims=True)
    sn = jnp.sum(pDCn, axis=1, keepdims=True)
    pDCp = jnp.where(sp > 0, pDCp / jnp.where(sp > 0, sp, 1.0), pDCp)
    pDCn = jnp.where(sn > 0, pDCn / jnp.where(sn > 0, sn, 1.0), pDCn)
    ent = lambda p: -jnp.sum(p * jnp.log(p + 1e-7), axis=1)
    return jnp.sum(ent(pD) - (prCp * ent(pDCp) + prCn * ent(pDCn)))


if __name__ == "__main__":
    key = jax.random.PRNGKey(0)
    k1, k2, k3, k4 = jax.random.split(key, 4)

    # Small demo consistent with the module: N=8 samples, 32 hash bits, 4 classes.
    N, nbit, nclass, nbins = 8, 32, 4, 16
    u = jax.random.normal(k1, (N, nbit), dtype=jnp.float32)
    labels = jax.random.randint(k2, (N,), 0, nclass)
    y = jax.nn.one_hot(labels, nclass, dtype=jnp.float32)

    loss = mihash_loss(u, y, nbins=nbins)
    jax.block_until_ready(loss)
    ref = _mihash_loss_ref(u, y, nbins=nbins)
    assert jnp.allclose(loss, ref, rtol=1e-3, atol=1e-3), (loss, ref)

    # Exercise the multi-tile (grid > 1, TM=256) path as well.
    N2, nclass2 = 512, 8
    u2 = jax.random.normal(k3, (N2, nbit), dtype=jnp.float32)
    y2 = jax.nn.one_hot(jax.random.randint(k4, (N2,), 0, nclass2), nclass2,
                        dtype=jnp.float32)
    loss2 = mihash_loss(u2, y2, nbins=nbins)
    jax.block_until_ready(loss2)
    ref2 = _mihash_loss_ref(u2, y2, nbins=nbins)
    assert jnp.allclose(loss2, ref2, rtol=5e-3, atol=5e-2), (loss2, ref2)

    print("KERNEL_OK")
</pallas_src>

<mosaic_0001>
module attributes {stable_mosaic.version = 11 : i64} {
  func.func @_mihash_kernel(%arg0: i32, %arg1: memref<8x32xf32, #tpu.memory_space<vmem>>, %arg2: memref<8x32xf32, #tpu.memory_space<vmem>>, %arg3: memref<8x1xi32, #tpu.memory_space<vmem>>, %arg4: memref<1x8xi32, #tpu.memory_space<vmem>>, %arg5: memref<8x1xf32, #tpu.memory_space<vmem>>, %arg6: memref<8x16xf32, #tpu.memory_space<vmem>>, %arg7: memref<8x16xf32, #tpu.memory_space<vmem>>) attributes {dimension_semantics = [#tpu.dimension_semantics<parallel>], iteration_bounds = array<i64: 1>, scalar_prefetch = 0 : i64, scratch_operands = 2 : i64, tpu.core_type = #tpu.core_type<tc>, window_params = [{transform_indices = @transform_0, window_bounds = array<i64: 8, 32>}, {pipeline_mode = #tpu.pipeline_mode<synchronous>, transform_indices = @transform_1, window_bounds = array<i64: 8, 32>}, {transform_indices = @transform_2, window_bounds = array<i64: 8, 1>}, {pipeline_mode = #tpu.pipeline_mode<synchronous>, transform_indices = @transform_3, window_bounds = array<i64: 1, 8>}, {transform_indices = @transform_4, window_bounds = array<i64: 8, 1>}]} {
    %c0 = arith.constant 0 : index
    %c0_0 = arith.constant 0 : index
    %0 = vector.load %arg3[%c0, %c0_0] : memref<8x1xi32, #tpu.memory_space<vmem>>, vector<8x1xi32>
    %c0_1 = arith.constant 0 : index
    %c0_2 = arith.constant 0 : index
    %1 = vector.load %arg4[%c0_1, %c0_2] : memref<1x8xi32, #tpu.memory_space<vmem>>, vector<1x8xi32>
    %2 = vector.broadcast %0 : vector<8x1xi32> to vector<8x8xi32>
    %3 = vector.broadcast %1 : vector<1x8xi32> to vector<8x8xi32>
    %4 = arith.cmpi eq, %2, %3 : vector<8x8xi32>
    %5 = tpu.iota {dimensions = array<i32: 1>} : vector<8x8xi32>
    %c8_i32 = arith.constant 8 : i32
    %6 = arith.muli %arg0, %c8_i32 : i32
    %7 = tpu.iota {dimensions = array<i32: 0>} : vector<8x1xi32>
    %8 = vector.broadcast %6 : i32 to vector<8x1xi32>
    %9 = arith.addi %8, %7 : vector<8x1xi32>
    %10 = vector.broadcast %9 : vector<8x1xi32> to vector<8x8xi32>
    %11 = arith.cmpi ne, %5, %10 : vector<8x8xi32>
    %12 = arith.andi %4, %11 : vector<8x8xi1>
    %cst = arith.constant 1.000000e+00 : f32
    %cst_3 = arith.constant 0.000000e+00 : f32
    %13 = vector.broadcast %cst : f32 to vector<8x8xf32>
    %14 = vector.broadcast %cst_3 : f32 to vector<8x8xf32>
    %15 = arith.select %12, %13, %14 : vector<8x8xi1>, vector<8x8xf32>
    %cst_4 = arith.constant dense<0.000000e+00> : vector<8xf32>
    %16 = vector.multi_reduction <add>, %15, %cst_4 [1] : vector<8x8xf32> to vector<8xf32>
    %17 = vector.shape_cast %16 : vector<8xf32> to vector<8x1xf32>
    %cst_5 = arith.constant 0.142857149 : f32
    %18 = vector.broadcast %cst_5 : f32 to vector<8x1xf32>
    %19 = arith.mulf %17, %18 : vector<8x1xf32>
    %cst_6 = arith.constant 1.000000e+00 : f32
    %20 = vector.broadcast %cst_6 : f32 to vector<8x1xf32>
    %21 = arith.subf %20, %19 : vector<8x1xf32>
    %c0_7 = arith.constant 0 : index
    %c0_8 = arith.constant 0 : index
    %22 = vector.load %arg1[%c0_7, %c0_8] : memref<8x32xf32, #tpu.memory_space<vmem>>, vector<8x32xf32>
    %23 = arith.negf %22 : vector<8x32xf32>
    %24 = math.exp %23 : vector<8x32xf32>
    %cst_9 = arith.constant 1.000000e+00 : f32
    %25 = vector.broadcast %cst_9 : f32 to vector<8x32xf32>
    %26 = arith.addf %25, %24 : vector<8x32xf32>
    %27 = arith.divf %25, %26 : vector<8x32xf32>
    %cst_10 = arith.constant 2.000000e+00 : f32
    %28 = vector.broadcast %cst_10 : f32 to vector<8x32xf32>
    %29 = arith.mulf %28, %27 : vector<8x32xf32>
    %cst_11 = arith.constant 1.000000e+00 : f32
    %30 = vector.broadcast %cst_11 : f32 to vector<8x32xf32>
    %31 = arith.subf %29, %30 : vector<8x32xf32>
    %c0_12 = arith.constant 0 : index
    %c0_13 = arith.constant 0 : index
    %32 = vector.load %arg2[%c0_12, %c0_13] : memref<8x32xf32, #tpu.memory_space<vmem>>, vector<8x32xf32>
    %33 = arith.negf %32 : vector<8x32xf32>
    %34 = math.exp %33 : vector<8x32xf32>
    %cst_14 = arith.constant 1.000000e+00 : f32
    %35 = vector.broadcast %cst_14 : f32 to vector<8x32xf32>
    %36 = arith.addf %35, %34 : vector<8x32xf32>
    %37 = arith.divf %35, %36 : vector<8x32xf32>
    %cst_15 = arith.constant 2.000000e+00 : f32
    %38 = vector.broadcast %cst_15 : f32 to vector<8x32xf32>
    %39 = arith.mulf %38, %37 : vector<8x32xf32>
    %cst_16 = arith.constant 1.000000e+00 : f32
    %40 = vector.broadcast %cst_16 : f32 to vector<8x32xf32>
    %41 = arith.subf %39, %40 : vector<8x32xf32>
    %cst_17 = arith.constant dense<0.000000e+00> : vector<8x8xf32>
    %42 = tpu.matmul %31, %41, %cst_17 {dimension_numbers = #tpu.dot_dimension_numbers<[1], [1], [0], [0], [0, 0, 1, 0], [], []>} : vector<8x32xf32>, vector<8x32xf32>, vector<8x8xf32> -> vector<8x8xf32>
    %cst_18 = arith.constant 3.200000e+01 : f32
    %43 = vector.broadcast %cst_18 : f32 to vector<8x8xf32>
    %44 = arith.subf %43, %42 : vector<8x8xf32>
    %cst_19 = arith.constant 2.500000e-01 : f32
    %45 = vector.broadcast %cst_19 : f32 to vector<8x8xf32>
    %46 = arith.mulf %44, %45 : vector<8x8xf32>
    %cst_20 = arith.constant 0.000000e+00 : f32
    %47 = vector.broadcast %cst_20 : f32 to vector<8x8xf32>
    %48 = arith.subf %46, %47 : vector<8x8xf32>
    %49 = math.absf %48 : vector<8x8xf32>
    %cst_21 = arith.constant 1.000000e+00 : f32
    %50 = vector.broadcast %cst_21 : f32 to vector<8x8xf32>
    %51 = arith.subf %50, %49 : vector<8x8xf32>
    %cst_22 = arith.constant 0.000000e+00 : f32
    %52 = vector.broadcast %cst_22 : f32 to vector<8x8xf32>
    %53 = arith.maximumf %51, %52 : vector<8x8xf32>
    %54 = arith.mulf %53, %15 : vector<8x8xf32>
    %cst_23 = arith.constant dense<0.000000e+00> : vector<8xf32>
    %55 = vector.multi_reduction <add>, %54, %cst_23 [1] : vector<8x8xf32> to vector<8xf32>
    %56 = vector.shape_cast %55 : vector<8xf32> to vector<8x1xf32>
    %cst_24 = arith.constant dense<0.000000e+00> : vector<8xf32>
    %57 = vector.multi_reduction <add>, %53, %cst_24 [1] : vector<8x8xf32> to vector<8xf32>
    %58 = vector.shape_cast %57 : vector<8xf32> to vector<8x1xf32>
    %c0_25 = arith.constant 0 : index
    %c0_26 = arith.constant 0 : index
    %59 = vector.load %arg6[%c0_25, %c0_26] : memref<8x16xf32, #tpu.memory_space<vmem>>, vector<8x1xf32>
    tpu.vector_store %arg6[%c0_25, %c0_26], %56 {strides = array<i32>} : memref<8x16xf32, #tpu.memory_space<vmem>>, vector<8x1xf32>,
    %c0_27 = arith.constant 0 : index
    %c0_28 = arith.constant 0 : index
    %60 = vector.load %arg7[%c0_27, %c0_28] : memref<8x16xf32, #tpu.memory_space<vmem>>, vector<8x1xf32>
    tpu.vector_store %arg7[%c0_27, %c0_28], %58 {strides = array<i32>} : memref<8x16xf32, #tpu.memory_space<vmem>>, vector<8x1xf32>,
    %cst_29 = arith.constant 1.000000e+00 : f32
    %61 = vector.broadcast %cst_29 : f32 to vector<8x8xf32>
    %62 = arith.subf %46, %61 : vector<8x8xf32>
    %63 = math.absf %62 : vector<8x8xf32>
    %cst_30 = arith.constant 1.000000e+00 : f32
    %64 = vector.broadcast %cst_30 : f32 to vector<8x8xf32>
    %65 = arith.subf %64, %63 : vector<8x8xf32>
    %cst_31 = arith.constant 0.000000e+00 : f32
    %66 = vector.broadcast %cst_31 : f32 to vector<8x8xf32>
    %67 = arith.maximumf %65, %66 : vector<8x8xf32>
    %68 = arith.mulf %67, %15 : vector<8x8xf32>
    %cst_32 = arith.constant dense<0.000000e+00> : vector<8xf32>
    %69 = vector.multi_reduction <add>, %68, %cst_32 [1] : vector<8x8xf32> to vector<8xf32>
    %70 = vector.shape_cast %69 : vector<8xf32> to vector<8x1xf32>
    %cst_33 = arith.constant dense<0.000000e+00> : vector<8xf32>
    %71 = vector.multi_reduction <add>, %67, %cst_33 [1] : vector<8x8xf32> to vector<8xf32>
    %72 = vector.shape_cast %71 : vector<8xf32> to vector<8x1xf32>
    %c0_34 = arith.constant 0 : index
    %c1 = arith.constant 1 : index
    %73 = vector.load %arg6[%c0_34, %c1] : memref<8x16xf32, #tpu.memory_space<vmem>>, vector<8x1xf32>
    tpu.vector_store %arg6[%c0_34, %c1], %70 {strides = array<i32>} : memref<8x16xf32, #tpu.memory_space<vmem>>, vector<8x1xf32>,
    %c0_35 = arith.constant 0 : index
    %c1_36 = arith.constant 1 : index
    %74 = vector.load %arg7[%c0_35, %c1_36] : memref<8x16xf32, #tpu.memory_space<vmem>>, vector<8x1xf32>
    tpu.vector_store %arg7[%c0_35, %c1_36], %72 {strides = array<i32>} : memref<8x16xf32, #tpu.memory_space<vmem>>, vector<8x1xf32>,
    %cst_37 = arith.constant 2.000000e+00 : f32
    %75 = vector.broadcast %cst_37 : f32 to vector<8x8xf32>
    %76 = arith.subf %46, %75 : vector<8x8xf32>
    %77 = math.absf %76 : vector<8x8xf32>
    %cst_38 = arith.constant 1.000000e+00 : f32
    %78 = vector.broadcast %cst_38 : f32 to vector<8x8xf32>
    %79 = arith.subf %78, %77 : vector<8x8xf32>
    %cst_39 = arith.constant 0.000000e+00 : f32
    %80 = vector.broadcast %cst_39 : f32 to vector<8x8xf32>
    %81 = arith.maximumf %79, %80 : vector<8x8xf32>
    %82 = arith.mulf %81, %15 : vector<8x8xf32>
    %cst_40 = arith.constant dense<0.000000e+00> : vector<8xf32>
    %83 = vector.multi_reduction <add>, %82, %cst_40 [1] : vector<8x8xf32> to vector<8xf32>
    %84 = vector.shape_cast %83 : vector<8xf32> to vector<8x1xf32>
    %cst_41 = arith.constant dense<0.000000e+00> : vector<8xf32>
    %85 = vector.multi_reduction <add>, %81, %cst_41 [1] : vector<8x8xf32> to vector<8xf32>
    %86 = vector.shape_cast %85 : vector<8xf32> to vector<8x1xf32>
    %c0_42 = arith.constant 0 : index
    %c2 = arith.constant 2 : index
    %87 = vector.load %arg6[%c0_42, %c2] : memref<8x16xf32, #tpu.memory_space<vmem>>, vector<8x1xf32>
    tpu.vector_store %arg6[%c0_42, %c2], %84 {strides = array<i32>} : memref<8x16xf32, #tpu.memory_space<vmem>>, vector<8x1xf32>,
    %c0_43 = arith.constant 0 : index
    %c2_44 = arith.constant 2 : index
    %88 = vector.load %arg7[%c0_43, %c2_44] : memref<8x16xf32, #tpu.memory_space<vmem>>, vector<8x1xf32>
    tpu.vector_store %arg7[%c0_43, %c2_44], %86 {strides = array<i32>} : memref<8x16xf32, #tpu.memory_space<vmem>>, vector<8x1xf32>,
    %cst_45 = arith.constant 3.000000e+00 : f32
    %89 = vector.broadcast %cst_45 : f32 to vector<8x8xf32>
    %90 = arith.subf %46, %89 : vector<8x8xf32>
    %91 = math.absf %90 : vector<8x8xf32>
    %cst_46 = arith.constant 1.000000e+00 : f32
    %92 = vector.broadcast %cst_46 : f32 to vector<8x8xf32>
    %93 = arith.subf %92, %91 : vector<8x8xf32>
    %cst_47 = arith.constant 0.000000e+00 : f32
    %94 = vector.broadcast %cst_47 : f32 to vector<8x8xf32>
    %95 = arith.maximumf %93, %94 : vector<8x8xf32>
    %96 = arith.mulf %95, %15 : vector<8x8xf32>
    %cst_48 = arith.constant dense<0.000000e+00> : vector<8xf32>
    %97 = vector.multi_reduction <add>, %96, %cst_48 [1] : vector<8x8xf32> to vector<8xf32>
    %98 = vector.shape_cast %97 : vector<8xf32> to vector<8x1xf32>
    %cst_49 = arith.constant dense<0.000000e+00> : vector<8xf32>
    %99 = vector.multi_reduction <add>, %95, %cst_49 [1] : vector<8x8xf32> to vector<8xf32>
    %100 = vector.shape_cast %99 : vector<8xf32> to vector<8x1xf32>
    %c0_50 = arith.constant 0 : index
    %c3 = arith.constant 3 : index
    %101 = vector.load %arg6[%c0_50, %c3] : memref<8x16xf32, #tpu.memory_space<vmem>>, vector<8x1xf32>
    tpu.vector_store %arg6[%c0_50, %c3], %98 {strides = array<i32>} : memref<8x16xf32, #tpu.memory_space<vmem>>, vector<8x1xf32>,
    %c0_51 = arith.constant 0 : index
    %c3_52 = arith.constant 3 : index
    %102 = vector.load %arg7[%c0_51, %c3_52] : memref<8x16xf32, #tpu.memory_space<vmem>>, vector<8x1xf32>
    tpu.vector_store %arg7[%c0_51, %c3_52], %100 {strides = array<i32>} : memref<8x16xf32, #tpu.memory_space<vmem>>, vector<8x1xf32>,
    %cst_53 = arith.constant 4.000000e+00 : f32
    %103 = vector.broadcast %cst_53 : f32 to vector<8x8xf32>
    %104 = arith.subf %46, %103 : vector<8x8xf32>
    %105 = math.absf %104 : vector<8x8xf32>
    %cst_54 = arith.constant 1.000000e+00 : f32
    %106 = vector.broadcast %cst_54 : f32 to vector<8x8xf32>
    %107 = arith.subf %106, %105 : vector<8x8xf32>
    %cst_55 = arith.constant 0.000000e+00 : f32
    %108 = vector.broadcast %cst_55 : f32 to vector<8x8xf32>
    %109 = arith.maximumf %107, %108 : vector<8x8xf32>
    %110 = arith.mulf %109, %15 : vector<8x8xf32>
    %cst_56 = arith.constant dense<0.000000e+00> : vector<8xf32>
    %111 = vector.multi_reduction <add>, %110, %cst_56 [1] : vector<8x8xf32> to vector<8xf32>
    %112 = vector.shape_cast %111 : vector<8xf32> to vector<8x1xf32>
    %cst_57 = arith.constant dense<0.000000e+00> : vector<8xf32>
    %113 = vector.multi_reduction <add>, %109, %cst_57 [1] : vector<8x8xf32> to vector<8xf32>
    %114 = vector.shape_cast %113 : vector<8xf32> to vector<8x1xf32>
    %c0_58 = arith.constant 0 : index
    %c4 = arith.constant 4 : index
    %115 = vector.load %arg6[%c0_58, %c4] : memref<8x16xf32, #tpu.memory_space<vmem>>, vector<8x1xf32>
    tpu.vector_store %arg6[%c0_58, %c4], %112 {strides = array<i32>} : memref<8x16xf32, #tpu.memory_space<vmem>>, vector<8x1xf32>,
    %c0_59 = arith.constant 0 : index
    %c4_60 = arith.constant 4 : index
    %116 = vector.load %arg7[%c0_59, %c4_60] : memref<8x16xf32, #tpu.memory_space<vmem>>, vector<8x1xf32>
    tpu.vector_store %arg7[%c0_59, %c4_60], %114 {strides = array<i32>} : memref<8x16xf32, #tpu.memory_space<vmem>>, vector<8x1xf32>,
    %cst_61 = arith.constant 5.000000e+00 : f32
    %117 = vector.broadcast %cst_61 : f32 to vector<8x8xf32>
    %118 = arith.subf %46, %117 : vector<8x8xf32>
    %119 = math.absf %118 : vector<8x8xf32>
    %cst_62 = arith.constant 1.000000e+00 : f32
    %120 = vector.broadcast %cst_62 : f32 to vector<8x8xf32>
    %121 = arith.subf %120, %119 : vector<8x8xf32>
    %cst_63 = arith.constant 0.000000e+00 : f32
    %122 = vector.broadcast %cst_63 : f32 to vector<8x8xf32>
    %123 = arith.maximumf %121, %122 : vector<8x8xf32>
    %124 = arith.mulf %123, %15 : vector<8x8xf32>
    %cst_64 = arith.constant dense<0.000000e+00> : vector<8xf32>
    %125 = vector.multi_reduction <add>, %124, %cst_64 [1] : vector<8x8xf32> to vector<8xf32>
    %126 = vector.shape_cast %125 : vector<8xf32> to vector<8x1xf32>
    %cst_65 = arith.constant dense<0.000000e+00> : vector<8xf32>
    %127 = vector.multi_reduction <add>, %123, %cst_65 [1] : vector<8x8xf32> to vector<8xf32>
    %128 = vector.shape_cast %127 : vector<8xf32> to vector<8x1xf32>
    %c0_66 = arith.constant 0 : index
    %c5 = arith.constant 5 : index
    %129 = vector.load %arg6[%c0_66, %c5] : memref<8x16xf32, #tpu.memory_space<vmem>>, vector<8x1xf32>
    tpu.vector_store %arg6[%c0_66, %c5], %126 {strides = array<i32>} : memref<8x16xf32, #tpu.memory_space<vmem>>, vector<8x1xf32>,
    %c0_67 = arith.constant 0 : index
    %c5_68 = arith.constant 5 : index
    %130 = vector.load %arg7[%c0_67, %c5_68] : memref<8x16xf32, #tpu.memory_space<vmem>>, vector<8x1xf32>
    tpu.vector_store %arg7[%c0_67, %c5_68], %128 {strides = array<i32>} : memref<8x16xf32, #tpu.memory_space<vmem>>, vector<8x1xf32>,
    %cst_69 = arith.constant 6.000000e+00 : f32
    %131 = vector.broadcast %cst_69 : f32 to vector<8x8xf32>
    %132 = arith.subf %46, %131 : vector<8x8xf32>
    %133 = math.absf %132 : vector<8x8xf32>
    %cst_70 = arith.constant 1.000000e+00 : f32
    %134 = vector.broadcast %cst_70 : f32 to vector<8x8xf32>
    %135 = arith.subf %134, %133 : vector<8x8xf32>
    %cst_71 = arith.constant 0.000000e+00 : f32
    %136 = vector.broadcast %cst_71 : f32 to vector<8x8xf32>
    %137 = arith.maximumf %135, %136 : vector<8x8xf32>
    %138 = arith.mulf %137, %15 : vector<8x8xf32>
    %cst_72 = arith.constant dense<0.000000e+00> : vector<8xf32>
    %139 = vector.multi_reduction <add>, %138, %cst_72 [1] : vector<8x8xf32> to vector<8xf32>
    %140 = vector.shape_cast %139 : vector<8xf32> to vector<8x1xf32>
    %cst_73 = arith.constant dense<0.000000e+00> : vector<8xf32>
    %141 = vector.multi_reduction <add>, %137, %cst_73 [1] : vector<8x8xf32> to vector<8xf32>
    %142 = vector.shape_cast %141 : vector<8xf32> to vector<8x1xf32>
    %c0_74 = arith.constant 0 : index
    %c6 = arith.constant 6 : index
    %143 = vector.load %arg6[%c0_74, %c6] : memref<8x16xf32, #tpu.memory_space<vmem>>, vector<8x1xf32>
    tpu.vector_store %arg6[%c0_74, %c6], %140 {strides = array<i32>} : memref<8x16xf32, #tpu.memory_space<vmem>>, vector<8x1xf32>,
    %c0_75 = arith.constant 0 : index
    %c6_76 = arith.constant 6 : index
    %144 = vector.load %arg7[%c0_75, %c6_76] : memref<8x16xf32, #tpu.memory_space<vmem>>, vector<8x1xf32>
    tpu.vector_store %arg7[%c0_75, %c6_76], %142 {strides = array<i32>} : memref<8x16xf32, #tpu.memory_space<vmem>>, vector<8x1xf32>,
    %cst_77 = arith.constant 7.000000e+00 : f32
    %145 = vector.broadcast %cst_77 : f32 to vector<8x8xf32>
    %146 = arith.subf %46, %145 : vector<8x8xf32>
    %147 = math.absf %146 : vector<8x8xf32>
    %cst_78 = arith.constant 1.000000e+00 : f32
    %148 = vector.broadcast %cst_78 : f32 to vector<8x8xf32>
    %149 = arith.subf %148, %147 : vector<8x8xf32>
    %cst_79 = arith.constant 0.000000e+00 : f32
    %150 = vector.broadcast %cst_79 : f32 to vector<8x8xf32>
    %151 = arith.maximumf %149, %150 : vector<8x8xf32>
    %152 = arith.mulf %151, %15 : vector<8x8xf32>
    %cst_80 = arith.constant dense<0.000000e+00> : vector<8xf32>
    %153 = vector.multi_reduction <add>, %152, %cst_80 [1] : vector<8x8xf32> to vector<8xf32>
    %154 = vector.shape_cast %153 : vector<8xf32> to vector<8x1xf32>
    %cst_81 = arith.constant dense<0.000000e+00> : vector<8xf32>
    %155 = vector.multi_reduction <add>, %151, %cst_81 [1] : vector<8x8xf32> to vector<8xf32>
    %156 = vector.shape_cast %155 : vector<8xf32> to vector<8x1xf32>
    %c0_82 = arith.constant 0 : index
    %c7 = arith.constant 7 : index
    %157 = vector.load %arg6[%c0_82, %c7] : memref<8x16xf32, #tpu.memory_space<vmem>>, vector<8x1xf32>
    tpu.vector_store %arg6[%c0_82, %c7], %154 {strides = array<i32>} : memref<8x16xf32, #tpu.memory_space<vmem>>, vector<8x1xf32>,
    %c0_83 = arith.constant 0 : index
    %c7_84 = arith.constant 7 : index
    %158 = vector.load %arg7[%c0_83, %c7_84] : memref<8x16xf32, #tpu.memory_space<vmem>>, vector<8x1xf32>
    tpu.vector_store %arg7[%c0_83, %c7_84], %156 {strides = array<i32>} : memref<8x16xf32, #tpu.memory_space<vmem>>, vector<8x1xf32>,
    %cst_85 = arith.constant 8.000000e+00 : f32
    %159 = vector.broadcast %cst_85 : f32 to vector<8x8xf32>
    %160 = arith.subf %46, %159 : vector<8x8xf32>
    %161 = math.absf %160 : vector<8x8xf32>
    %cst_86 = arith.constant 1.000000e+00 : f32
    %162 = vector.broadcast %cst_86 : f32 to vector<8x8xf32>
    %163 = arith.subf %162, %161 : vector<8x8xf32>
    %cst_87 = arith.constant 0.000000e+00 : f32
    %164 = vector.broadcast %cst_87 : f32 to vector<8x8xf32>
    %165 = arith.maximumf %163, %164 : vector<8x8xf32>
    %166 = arith.mulf %165, %15 : vector<8x8xf32>
    %cst_88 = arith.constant dense<0.000000e+00> : vector<8xf32>
    %167 = vector.multi_reduction <add>, %166, %cst_88 [1] : vector<8x8xf32> to vector<8xf32>
    %168 = vector.shape_cast %167 : vector<8xf32> to vector<8x1xf32>
    %cst_89 = arith.constant dense<0.000000e+00> : vector<8xf32>
    %169 = vector.multi_reduction <add>, %165, %cst_89 [1] : vector<8x8xf32> to vector<8xf32>
    %170 = vector.shape_cast %169 : vector<8xf32> to vector<8x1xf32>
    %c0_90 = arith.constant 0 : index
    %c8 = arith.constant 8 : index
    %171 = vector.load %arg6[%c0_90, %c8] : memref<8x16xf32, #tpu.memory_space<vmem>>, vector<8x1xf32>
    tpu.vector_store %arg6[%c0_90, %c8], %168 {strides = array<i32>} : memref<8x16xf32, #tpu.memory_space<vmem>>, vector<8x1xf32>,
    %c0_91 = arith.constant 0 : index
    %c8_92 = arith.constant 8 : index
    %172 = vector.load %arg7[%c0_91, %c8_92] : memref<8x16xf32, #tpu.memory_space<vmem>>, vector<8x1xf32>
    tpu.vector_store %arg7[%c0_91, %c8_92], %170 {strides = array<i32>} : memref<8x16xf32, #tpu.memory_space<vmem>>, vector<8x1xf32>,
    %cst_93 = arith.constant 9.000000e+00 : f32
    %173 = vector.broadcast %cst_93 : f32 to vector<8x8xf32>
    %174 = arith.subf %46, %173 : vector<8x8xf32>
    %175 = math.absf %174 : vector<8x8xf32>
    %cst_94 = arith.constant 1.000000e+00 : f32
    %176 = vector.broadcast %cst_94 : f32 to vector<8x8xf32>
    %177 = arith.subf %176, %175 : vector<8x8xf32>
    %cst_95 = arith.constant 0.000000e+00 : f32
    %178 = vector.broadcast %cst_95 : f32 to vector<8x8xf32>
    %179 = arith.maximumf %177, %178 : vector<8x8xf32>
    %180 = arith.mulf %179, %15 : vector<8x8xf32>
    %cst_96 = arith.constant dense<0.000000e+00> : vector<8xf32>
    %181 = vector.multi_reduction <add>, %180, %cst_96 [1] : vector<8x8xf32> to vector<8xf32>
    %182 = vector.shape_cast %181 : vector<8xf32> to vector<8x1xf32>
    %cst_97 = arith.constant dense<0.000000e+00> : vector<8xf32>
    %183 = vector.multi_reduction <add>, %179, %cst_97 [1] : vector<8x8xf32> to vector<8xf32>
    %184 = vector.shape_cast %183 : vector<8xf32> to vector<8x1xf32>
    %c0_98 = arith.constant 0 : index
    %c9 = arith.constant 9 : index
    %185 = vector.load %arg6[%c0_98, %c9] : memref<8x16xf32, #tpu.memory_space<vmem>>, vector<8x1xf32>
    tpu.vector_store %arg6[%c0_98, %c9], %182 {strides = array<i32>} : memref<8x16xf32, #tpu.memory_space<vmem>>, vector<8x1xf32>,
    %c0_99 = arith.constant 0 : index
    %c9_100 = arith.constant 9 : index
    %186 = vector.load %arg7[%c0_99, %c9_100] : memref<8x16xf32, #tpu.memory_space<vmem>>, vector<8x1xf32>
    tpu.vector_store %arg7[%c0_99, %c9_100], %184 {strides = array<i32>} : memref<8x16xf32, #tpu.memory_space<vmem>>, vector<8x1xf32>,
    %cst_101 = arith.constant 1.000000e+01 : f32
    %187 = vector.broadcast %cst_101 : f32 to vector<8x8xf32>
    %188 = arith.subf %46, %187 : vector<8x8xf32>
    %189 = math.absf %188 : vector<8x8xf32>
    %cst_102 = arith.constant 1.000000e+00 : f32
    %190 = vector.broadcast %cst_102 : f32 to vector<8x8xf32>
    %191 = arith.subf %190, %189 : vector<8x8xf32>
    %cst_103 = arith.constant 0.000000e+00 : f32
    %192 = vector.broadcast %cst_103 : f32 to vector<8x8xf32>
    %193 = arith.maximumf %191, %192 : vector<8x8xf32>
    %194 = arith.mulf %193, %15 : vector<8x8xf32>
    %cst_104 = arith.constant dense<0.000000e+00> : vector<8xf32>
    %195 = vector.multi_reduction <add>, %194, %cst_104 [1] : vector<8x8xf32> to vector<8xf32>
    %196 = vector.shape_cast %195 : vector<8xf32> to vector<8x1xf32>
    %cst_105 = arith.constant dense<0.000000e+00> : vector<8xf32>
    %197 = vector.multi_reduction <add>, %193, %cst_105 [1] : vector<8x8xf32> to vector<8xf32>
    %198 = vector.shape_cast %197 : vector<8xf32> to vector<8x1xf32>
    %c0_106 = arith.constant 0 : index
    %c10 = arith.constant 10 : index
    %199 = vector.load %arg6[%c0_106, %c10] : memref<8x16xf32, #tpu.memory_space<vmem>>, vector<8x1xf32>
    tpu.vector_store %arg6[%c0_106, %c10], %196 {strides = array<i32>} : memref<8x16xf32, #tpu.memory_space<vmem>>, vector<8x1xf32>,
    %c0_107 = arith.constant 0 : index
    %c10_108 = arith.constant 10 : index
    %200 = vector.load %arg7[%c0_107, %c10_108] : memref<8x16xf32, #tpu.memory_space<vmem>>, vector<8x1xf32>
    tpu.vector_store %arg7[%c0_107, %c10_108], %198 {strides = array<i32>} : memref<8x16xf32, #tpu.memory_space<vmem>>, vector<8x1xf32>,
    %cst_109 = arith.constant 1.100000e+01 : f32
    %201 = vector.broadcast %cst_109 : f32 to vector<8x8xf32>
    %202 = arith.subf %46, %201 : vector<8x8xf32>
    %203 = math.absf %202 : vector<8x8xf32>
    %cst_110 = arith.constant 1.000000e+00 : f32
    %204 = vector.broadcast %cst_110 : f32 to vector<8x8xf32>
    %205 = arith.subf %204, %203 : vector<8x8xf32>
    %cst_111 = arith.constant 0.000000e+00 : f32
    %206 = vector.broadcast %cst_111 : f32 to vector<8x8xf32>
    %207 = arith.maximumf %205, %206 : vector<8x8xf32>
    %208 = arith.mulf %207, %15 : vector<8x8xf32>
    %cst_112 = arith.constant dense<0.000000e+00> : vector<8xf32>
    %209 = vector.multi_reduction <add>, %208, %cst_112 [1] : vector<8x8xf32> to vector<8xf32>
    %210 = vector.shape_cast %209 : vector<8xf32> to vector<8x1xf32>
    %cst_113 = arith.constant dense<0.000000e+00> : vector<8xf32>
    %211 = vector.multi_reduction <add>, %207, %cst_113 [1] : vector<8x8xf32> to vector<8xf32>
    %212 = vector.shape_cast %211 : vector<8xf32> to vector<8x1xf32>
    %c0_114 = arith.constant 0 : index
    %c11 = arith.constant 11 : index
    %213 = vector.load %arg6[%c0_114, %c11] : memref<8x16xf32, #tpu.memory_space<vmem>>, vector<8x1xf32>
    tpu.vector_store %arg6[%c0_114, %c11], %210 {strides = array<i32>} : memref<8x16xf32, #tpu.memory_space<vmem>>, vector<8x1xf32>,
    %c0_115 = arith.constant 0 : index
    %c11_116 = arith.constant 11 : index
    %214 = vector.load %arg7[%c0_115, %c11_116] : memref<8x16xf32, #tpu.memory_space<vmem>>, vector<8x1xf32>
    tpu.vector_store %arg7[%c0_115, %c11_116], %212 {strides = array<i32>} : memref<8x16xf32, #tpu.memory_space<vmem>>, vector<8x1xf32>,
    %cst_117 = arith.constant 1.200000e+01 : f32
    %215 = vector.broadcast %cst_117 : f32 to vector<8x8xf32>
    %216 = arith.subf %46, %215 : vector<8x8xf32>
    %217 = math.absf %216 : vector<8x8xf32>
    %cst_118 = arith.constant 1.000000e+00 : f32
    %218 = vector.broadcast %cst_118 : f32 to vector<8x8xf32>
    %219 = arith.subf %218, %217 : vector<8x8xf32>
    %cst_119 = arith.constant 0.000000e+00 : f32
    %220 = vector.broadcast %cst_119 : f32 to vector<8x8xf32>
    %221 = arith.maximumf %219, %220 : vector<8x8xf32>
    %222 = arith.mulf %221, %15 : vector<8x8xf32>
    %cst_120 = arith.constant dense<0.000000e+00> : vector<8xf32>
    %223 = vector.multi_reduction <add>, %222, %cst_120 [1] : vector<8x8xf32> to vector<8xf32>
    %224 = vector.shape_cast %223 : vector<8xf32> to vector<8x1xf32>
    %cst_121 = arith.constant dense<0.000000e+00> : vector<8xf32>
    %225 = vector.multi_reduction <add>, %221, %cst_121 [1] : vector<8x8xf32> to vector<8xf32>
    %226 = vector.shape_cast %225 : vector<8xf32> to vector<8x1xf32>
    %c0_122 = arith.constant 0 : index
    %c12 = arith.constant 12 : index
    %227 = vector.load %arg6[%c0_122, %c12] : memref<8x16xf32, #tpu.memory_space<vmem>>, vector<8x1xf32>
    tpu.vector_store %arg6[%c0_122, %c12], %224 {strides = array<i32>} : memref<8x16xf32, #tpu.memory_space<vmem>>, vector<8x1xf32>,
    %c0_123 = arith.constant 0 : index
    %c12_124 = arith.constant 12 : index
    %228 = vector.load %arg7[%c0_123, %c12_124] : memref<8x16xf32, #tpu.memory_space<vmem>>, vector<8x1xf32>
    tpu.vector_store %arg7[%c0_123, %c12_124], %226 {strides = array<i32>} : memref<8x16xf32, #tpu.memory_space<vmem>>, vector<8x1xf32>,
    %cst_125 = arith.constant 1.300000e+01 : f32
    %229 = vector.broadcast %cst_125 : f32 to vector<8x8xf32>
    %230 = arith.subf %46, %229 : vector<8x8xf32>
    %231 = math.absf %230 : vector<8x8xf32>
    %cst_126 = arith.constant 1.000000e+00 : f32
    %232 = vector.broadcast %cst_126 : f32 to vector<8x8xf32>
    %233 = arith.subf %232, %231 : vector<8x8xf32>
    %cst_127 = arith.constant 0.000000e+00 : f32
    %234 = vector.broadcast %cst_127 : f32 to vector<8x8xf32>
    %235 = arith.maximumf %233, %234 : vector<8x8xf32>
    %236 = arith.mulf %235, %15 : vector<8x8xf32>
    %cst_128 = arith.constant dense<0.000000e+00> : vector<8xf32>
    %237 = vector.multi_reduction <add>, %236, %cst_128 [1] : vector<8x8xf32> to vector<8xf32>
    %238 = vector.shape_cast %237 : vector<8xf32> to vector<8x1xf32>
    %cst_129 = arith.constant dense<0.000000e+00> : vector<8xf32>
    %239 = vector.multi_reduction <add>, %235, %cst_129 [1] : vector<8x8xf32> to vector<8xf32>
    %240 = vector.shape_cast %239 : vector<8xf32> to vector<8x1xf32>
    %c0_130 = arith.constant 0 : index
    %c13 = arith.constant 13 : index
    %241 = vector.load %arg6[%c0_130, %c13] : memref<8x16xf32, #tpu.memory_space<vmem>>, vector<8x1xf32>
    tpu.vector_store %arg6[%c0_130, %c13], %238 {strides = array<i32>} : memref<8x16xf32, #tpu.memory_space<vmem>>, vector<8x1xf32>,
    %c0_131 = arith.constant 0 : index
    %c13_132 = arith.constant 13 : index
    %242 = vector.load %arg7[%c0_131, %c13_132] : memref<8x16xf32, #tpu.memory_space<vmem>>, vector<8x1xf32>
    tpu.vector_store %arg7[%c0_131, %c13_132], %240 {strides = array<i32>} : memref<8x16xf32, #tpu.memory_space<vmem>>, vector<8x1xf32>,
    %cst_133 = arith.constant 1.400000e+01 : f32
    %243 = vector.broadcast %cst_133 : f32 to vector<8x8xf32>
    %244 = arith.subf %46, %243 : vector<8x8xf32>
    %245 = math.absf %244 : vector<8x8xf32>
    %cst_134 = arith.constant 1.000000e+00 : f32
    %246 = vector.broadcast %cst_134 : f32 to vector<8x8xf32>
    %247 = arith.subf %246, %245 : vector<8x8xf32>
    %cst_135 = arith.constant 0.000000e+00 : f32
    %248 = vector.broadcast %cst_135 : f32 to vector<8x8xf32>
    %249 = arith.maximumf %247, %248 : vector<8x8xf32>
    %250 = arith.mulf %249, %15 : vector<8x8xf32>
    %cst_136 = arith.constant dense<0.000000e+00> : vector<8xf32>
    %251 = vector.multi_reduction <add>, %250, %cst_136 [1] : vector<8x8xf32> to vector<8xf32>
    %252 = vector.shape_cast %251 : vector<8xf32> to vector<8x1xf32>
    %cst_137 = arith.constant dense<0.000000e+00> : vector<8xf32>
    %253 = vector.multi_reduction <add>, %249, %cst_137 [1] : vector<8x8xf32> to vector<8xf32>
    %254 = vector.shape_cast %253 : vector<8xf32> to vector<8x1xf32>
    %c0_138 = arith.constant 0 : index
    %c14 = arith.constant 14 : index
    %255 = vector.load %arg6[%c0_138, %c14] : memref<8x16xf32, #tpu.memory_space<vmem>>, vector<8x1xf32>
    tpu.vector_store %arg6[%c0_138, %c14], %252 {strides = array<i32>} : memref<8x16xf32, #tpu.memory_space<vmem>>, vector<8x1xf32>,
    %c0_139 = arith.constant 0 : index
    %c14_140 = arith.constant 14 : index
    %256 = vector.load %arg7[%c0_139, %c14_140] : memref<8x16xf32, #tpu.memory_space<vmem>>, vector<8x1xf32>
    tpu.vector_store %arg7[%c0_139, %c14_140], %254 {strides = array<i32>} : memref<8x16xf32, #tpu.memory_space<vmem>>, vector<8x1xf32>,
    %cst_141 = arith.constant 1.500000e+01 : f32
    %257 = vector.broadcast %cst_141 : f32 to vector<8x8xf32>
    %258 = arith.subf %46, %257 : vector<8x8xf32>
    %259 = math.absf %258 : vector<8x8xf32>
    %cst_142 = arith.constant 1.000000e+00 : f32
    %260 = vector.broadcast %cst_142 : f32 to vector<8x8xf32>
    %261 = arith.subf %260, %259 : vector<8x8xf32>
    %cst_143 = arith.constant 0.000000e+00 : f32
    %262 = vector.broadcast %cst_143 : f32 to vector<8x8xf32>
    %263 = arith.maximumf %261, %262 : vector<8x8xf32>
    %264 = arith.mulf %263, %15 : vector<8x8xf32>
    %cst_144 = arith.constant dense<0.000000e+00> : vector<8xf32>
    %265 = vector.multi_reduction <add>, %264, %cst_144 [1] : vector<8x8xf32> to vector<8xf32>
    %266 = vector.shape_cast %265 : vector<8xf32> to vector<8x1xf32>
    %cst_145 = arith.constant dense<0.000000e+00> : vector<8xf32>
    %267 = vector.multi_reduction <add>, %263, %cst_145 [1] : vector<8x8xf32> to vector<8xf32>
    %268 = vector.shape_cast %267 : vector<8xf32> to vector<8x1xf32>
    %c0_146 = arith.constant 0 : index
    %c15 = arith.constant 15 : index
    %269 = vector.load %arg6[%c0_146, %c15] : memref<8x16xf32, #tpu.memory_space<vmem>>, vector<8x1xf32>
    tpu.vector_store %arg6[%c0_146, %c15], %266 {strides = array<i32>} : memref<8x16xf32, #tpu.memory_space<vmem>>, vector<8x1xf32>,
    %c0_147 = arith.constant 0 : index
    %c15_148 = arith.constant 15 : index
    %270 = vector.load %arg7[%c0_147, %c15_148] : memref<8x16xf32, #tpu.memory_space<vmem>>, vector<8x1xf32>
    tpu.vector_store %arg7[%c0_147, %c15_148], %268 {strides = array<i32>} : memref<8x16xf32, #tpu.memory_space<vmem>>, vector<8x1xf32>,
    %c0_149 = arith.constant 0 : index
    %c0_150 = arith.constant 0 : index
    %271 = vector.load %arg6[%c0_149, %c0_150] : memref<8x16xf32, #tpu.memory_space<vmem>>, vector<8x16xf32>
    %c0_151 = arith.constant 0 : index
    %c0_152 = arith.constant 0 : index
    %272 = vector.load %arg7[%c0_151, %c0_152] : memref<8x16xf32, #tpu.memory_space<vmem>>, vector<8x16xf32>
    %273 = arith.subf %272, %271 : vector<8x16xf32>
    %cst_153 = arith.constant dense<0.000000e+00> : vector<8xf32>
    %274 = vector.multi_reduction <add>, %271, %cst_153 [1] : vector<8x16xf32> to vector<8xf32>
    %275 = vector.shape_cast %274 : vector<8xf32> to vector<8x1xf32>
    %cst_154 = arith.constant dense<0.000000e+00> : vector<8xf32>
    %276 = vector.multi_reduction <add>, %273, %cst_154 [1] : vector<8x16xf32> to vector<8xf32>
    %277 = vector.shape_cast %276 : vector<8xf32> to vector<8x1xf32>
    %cst_155 = arith.constant 0.000000e+00 : f32
    %278 = vector.broadcast %cst_155 : f32 to vector<8x1xf32>
    %279 = arith.cmpf ogt, %275, %278 : vector<8x1xf32>
    %cst_156 = arith.constant 1.000000e+00 : f32
    %280 = vector.broadcast %cst_156 : f32 to vector<8x1xf32>
    %281 = arith.select %279, %275, %280 : vector<8x1xi1>, vector<8x1xf32>
    %cst_157 = arith.constant 1.000000e+00 : f32
    %282 = vector.broadcast %cst_157 : f32 to vector<8x1xf32>
    %283 = arith.divf %282, %281 : vector<8x1xf32>
    %284 = vector.broadcast %283 : vector<8x1xf32> to vector<8x16xf32>
    %285 = arith.mulf %271, %284 : vector<8x16xf32>
    %cst_158 = arith.constant 0.000000e+00 : f32
    %286 = vector.broadcast %cst_158 : f32 to vector<8x1xf32>
    %287 = arith.cmpf ogt, %277, %286 : vector<8x1xf32>
    %cst_159 = arith.constant 1.000000e+00 : f32
    %288 = vector.broadcast %cst_159 : f32 to vector<8x1xf32>
    %289 = arith.select %287, %277, %288 : vector<8x1xi1>, vector<8x1xf32>
    %cst_160 = arith.constant 1.000000e+00 : f32
    %290 = vector.broadcast %cst_160 : f32 to vector<8x1xf32>
    %291 = arith.divf %290, %289 : vector<8x1xf32>
    %292 = vector.broadcast %291 : vector<8x1xf32> to vector<8x16xf32>
    %293 = arith.mulf %273, %292 : vector<8x16xf32>
    %cst_161 = arith.constant 0.142857149 : f32
    %294 = vector.broadcast %cst_161 : f32 to vector<8x16xf32>
    %295 = arith.mulf %272, %294 : vector<8x16xf32>
    %cst_162 = arith.constant 1.000000e-07 : f32
    %296 = vector.broadcast %cst_162 : f32 to vector<8x16xf32>
    %297 = arith.addf %295, %296 : vector<8x16xf32>
    %298 = math.log %297 : vector<8x16xf32>
    %299 = arith.mulf %295, %298 : vector<8x16xf32>
    %cst_163 = arith.constant dense<0.000000e+00> : vector<8xf32>
    %300 = vector.multi_reduction <add>, %299, %cst_163 [1] : vector<8x16xf32> to vector<8xf32>
    %301 = vector.shape_cast %300 : vector<8xf32> to vector<8x1xf32>
    %cst_164 = arith.constant 0.000000e+00 : f32
    %302 = vector.broadcast %cst_164 : f32 to vector<8x1xf32>
    %303 = arith.subf %302, %301 : vector<8x1xf32>
    %cst_165 = arith.constant 1.000000e-07 : f32
    %304 = vector.broadcast %cst_165 : f32 to vector<8x16xf32>
    %305 = arith.addf %285, %304 : vector<8x16xf32>
    %306 = math.log %305 : vector<8x16xf32>
    %307 = arith.mulf %285, %306 : vector<8x16xf32>
    %cst_166 = arith.constant dense<0.000000e+00> : vector<8xf32>
    %308 = vector.multi_reduction <add>, %307, %cst_166 [1] : vector<8x16xf32> to vector<8xf32>
    %309 = vector.shape_cast %308 : vector<8xf32> to vector<8x1xf32>
    %cst_167 = arith.constant 0.000000e+00 : f32
    %310 = vector.broadcast %cst_167 : f32 to vector<8x1xf32>
    %311 = arith.subf %310, %309 : vector<8x1xf32>
    %cst_168 = arith.constant 1.000000e-07 : f32
    %312 = vector.broadcast %cst_168 : f32 to vector<8x16xf32>
    %313 = arith.addf %293, %312 : vector<8x16xf32>
    %314 = math.log %313 : vector<8x16xf32>
    %315 = arith.mulf %293, %314 : vector<8x16xf32>
    %cst_169 = arith.constant dense<0.000000e+00> : vector<8xf32>
    %316 = vector.multi_reduction <add>, %315, %cst_169 [1] : vector<8x16xf32> to vector<8xf32>
    %317 = vector.shape_cast %316 : vector<8xf32> to vector<8x1xf32>
    %cst_170 = arith.constant 0.000000e+00 : f32
    %318 = vector.broadcast %cst_170 : f32 to vector<8x1xf32>
    %319 = arith.subf %318, %317 : vector<8x1xf32>
    %320 = arith.mulf %19, %311 : vector<8x1xf32>
    %321 = arith.mulf %21, %319 : vector<8x1xf32>
    %322 = arith.addf %320, %321 : vector<8x1xf32>
    %323 = arith.subf %303, %322 : vector<8x1xf32>
    %c0_171 = arith.constant 0 : index
    %c0_172 = arith.constant 0 : index
    %324 = vector.load %arg5[%c0_171, %c0_172] : memref<8x1xf32, #tpu.memory_space<vmem>>, vector<8x1xf32>
    tpu.vector_store %arg5[%c0_171, %c0_172], %323 {strides = array<i32>} : memref<8x1xf32, #tpu.memory_space<vmem>>, vector<8x1xf32>,
    return
  }
  func.func @transform_0(%arg0: i32) -> (i32, i32) {
    %c0_i32 = arith.constant 0 : i32
    %c0_i32_0 = arith.constant 0 : i32
    return %arg0, %c0_i32 : i32, i32
  }
  func.func @transform_1(%arg0: i32) -> (i32, i32) {
    %c0_i32 = arith.constant 0 : i32
    %c0_i32_0 = arith.constant 0 : i32
    %c0_i32_1 = arith.constant 0 : i32
    return %c0_i32, %c0_i32_0 : i32, i32
  }
  func.func @transform_2(%arg0: i32) -> (i32, i32) {
    %c0_i32 = arith.constant 0 : i32
    %c0_i32_0 = arith.constant 0 : i32
    return %arg0, %c0_i32 : i32, i32
  }
  func.func @transform_3(%arg0: i32) -> (i32, i32) {
    %c0_i32 = arith.constant 0 : i32
    %c0_i32_0 = arith.constant 0 : i32
    %c0_i32_1 = arith.constant 0 : i32
    return %c0_i32, %c0_i32_0 : i32, i32
  }
  func.func @transform_4(%arg0: i32) -> (i32, i32) {
    %c0_i32 = arith.constant 0 : i32
    %c0_i32_0 = arith.constant 0 : i32
    return %arg0, %c0_i32 : i32, i32
  }
}

</mosaic_0001>

<bundles_post_ra>
// kernel: tpu_custom_call.1
= control target key start
LH: loop header
LB: loop body
LE: loop exit
PB: predicated region body
PF: predicated region fallthrough
CT: control target
= control target key end

     0   :  { %9 = vsyncpa [#allocation5], 0  ;;  %s501_s18 = smov [#allocation4]   ;;  %s673_s0 = inlined_call_operand.vmem [shape: f32[8,32], index: 0, kind: input, shape index: {}]   ;;  %s674_s1 = inlined_call_operand.hbm [shape: f32[8,32], index: 1, kind: input, shape index: {}]   ;;  %s675_s2 = inlined_call_operand.vmem [shape: s32[8,1], index: 2, kind: input, shape index: {}]   ;;  %s676_s3 = inlined_call_operand.vmem [shape: s32[1,8], index: 3, kind: input, shape index: {}]   ;;  %s677_s4 = inlined_call_operand.vmem [shape: f32[8,1], index: 4, kind: output, shape index: {}]  }
   0x1   :  { %s17_s17 = sshll.u32 %s674_s1, 4  ;;  %s19_s19 = sshll.u32 %s501_s18, 4  ;;  %s18_s17 = int_to_ptr.hbm [resolvable:$true] %s17_s17  ;;  %s20_s19 = int_to_ptr.vmem [resolvable:$true] %s19_s19 }
   0x2   :  { %22 = dma.hbm_to_vmem [thread:$0]  %s18_s17, 128, %s20_s19, [#allocation5]  }
   0x3   :  { %499 = dma.done.wait [#allocation5], 128  }
   0x4   :  { %500 = vsyncadd [#allocation5], 4294967168  ;;  %v76_v0 = vld [vmem:[#allocation4] sm:$0xff]  ;;  %v54_v1 = vld [vmem:[%s673_s0] sm:$0xff]  ;;  %v502_v5 = vmov 0   ;;  %vm98_vm8 = vcmask 261120   ;;  %v38_v34 = vlaneseq }
   0x5   :  { %v433_v2 = vmul.f32 -1.442695, %v76_v0  ;;  %v431_v3 = vmul.f32 -1.442695, %v54_v1  ;;  %v31_v4 = vld [vmem:[%s675_s2] sm:$0xff]  ;;  %455 = vset.pattern.permute.xlu0 %v502_v5  ;;  %v503_v50 = vmov 0.0  }
   0x6   :  { %34 = vperm.xlu0 %455, %v31_v4   ;;  %v456_v35 = vld [vmem:[%s676_s3] ss:$0 sm:$0xff]  ;;  %v39_v36 = vand.u32 127, %v38_v34  ;;  %v42_v37 = vshrl.u32 %v38_v34, 7  ;;  %vm48_vm12 = vcmask 64512   ;;  %vm137_vm13 = vcmask 7168  }
   0x7   :  { %457 = vpow2.f32 %v433_v2  ;;  %vm151_vm14 = vcmask 15368   ;;  %vm165_vm15 = vcmask 23568  }
   0x8   :  { %459 = vpow2.f32 %v431_v3  ;;  %vm45_vm9 = vcmp.ne.s32.totalorder %v39_v36, %v42_v37 }
   0xd   :  { %v458_v6 = vpop.eup %457 }
   0xe   :  { %v460_v7 = vpop.eup %459  ;;  %v80_v8 = vadd.f32 1.0, %v458_v6 }
   0xf   :  { %v58_v9 = vadd.f32 1.0, %v460_v7 }
  0x10   :  { %461 = vrcp.f32 %v80_v8  ;;  %vm86_vm0 = vweird.f32 %v80_v8  ;;  %v92_v13 = vand.u32 2147483648, %v80_v8  ;;  %v90_v16 = vand.u32 2147483647, %v80_v8 }
  0x11   :  { %463 = vrcp.f32 %v58_v9  ;;  %v70_v17 = vand.u32 2147483648, %v58_v9  ;;  %vm64_vm2 = vweird.f32 %v58_v9  ;;  %v68_v19 = vand.u32 2147483647, %v58_v9 }
  0x12   :  { %v93_v21 = vor.u32 1.1754944e-38, %v92_v13  ;;  %vm91_vm5 = vcmp.eq.f32.partialorder %v90_v16, 8.507059e+37 }
  0x13   :  { %v71_v24 = vor.u32 1.1754944e-38, %v70_v17  ;;  %vm69_vm7 = vcmp.eq.f32.partialorder %v68_v19, 8.507059e+37 }
  0x16   :  { %v462_v10 = vpop.eup %461 }
  0x17   :  { %v464_v11 = vpop.eup %463  ;;  %v82_v12 = vmul.f32 %v462_v10, %v80_v8  ;;  %vm87_vm1 = vweird.f32 %v462_v10 }
  0x18   :  { %v60_v14 = vmul.f32 %v464_v11, %v58_v9  ;;  %vm65_vm3 = vweird.f32 %v464_v11  ;;  %vm88_vm4 = vmor %vm86_vm0, %vm87_vm1  ;;  %vm179_vm0 = vcmask 31768   ;;  %vm193_vm1 = vcmask 39968  }
  0x19   :  { %v83_v15 = vsub.f32 1.0, %v82_v12  ;;  %vm66_vm6 = vmor %vm64_vm2, %vm65_vm3  ;;  %vm207_vm2 = vcmask 48168   ;;  %vm221_vm3 = vcmask 56368  }
  0x1a   :  { %v61_v18 = vsub.f32 1.0, %v60_v14 }
  0x1b   :  { %v84_v20 = vmul.f32 %v462_v10, %v83_v15 }
  0x1c   :  { %v62_v22 = vmul.f32 %v464_v11, %v61_v18 }
  0x1d   :  { %v85_v23 = vadd.f32 %v462_v10, %v84_v20 }
  0x1e   :  { %v63_v25 = vadd.f32 %v464_v11, %v62_v22 }
  0x1f   :  { %v89_v26 = vsel %vm88_vm4, %v462_v10, %v85_v23  ;;  %vm235_vm4 = vcmask 64568  }
  0x20   :  { %v94_v27 = vsel %vm91_vm5, %v93_v21, %v89_v26  ;;  %v67_v28 = vsel %vm66_vm6, %v464_v11, %v63_v25  ;;  %vm249_vm5 = vcmask 72768   ;;  %vm263_vm6 = vcmask 80968  }
  0x21   :  { %v96_v29 = vmul.f32 2.0, %v94_v27  ;;  %v72_v30 = vsel %vm69_vm7, %v71_v24, %v67_v28  ;;  %vm277_vm7 = vcmask 89168  }
  0x22   :  { %v74_v31 = vmul.f32 2.0, %v72_v30 }
  0x23   :  { %v434_v32 = vadd.f32 -1.0, %v96_v29 }
  0x24   :  { %v432_v33 = vadd.f32 -1.0, %v74_v31 }
  0x25   :  { %435 = vmatpush.xpose.msk.msra.mxu0 %vm98_vm8, %v434_v32 }
  0x28   :  { %436 = vmatmul.msk.f32.vlgmr.msra.gmra.mxu0 %vm98_vm8, %v432_v33  ;;  %vm291_vm8 = vcmask 97368  }
  0x78   :  { %v35_v38 = vpop.permute.xlu0 %34 }
  0x79   :  { %vm37_vm10 = vcmp.eq.s32.totalorder %v35_v38, %v456_v35 }
  0x7a   :  { %vm46_vm11 = vmand %vm37_vm10, %vm45_vm9  ;;  %vm305_vm9 = vcmask 105568   ;;  %vm319_vm10 = vcmask 113768  }
  0x7b   :  { %v548_v51 = vsel %vm46_vm11, 1.0, %v503_v50  ;;  %vm333_vm11 = vcmask 121968  }
  0xa5   :  { %v122_v39 = vpop.f32.mrf.mxu0 }
  0xa6   :  { %v125_v40 = vsub.f32 32.0, %v122_v39 }
  0xa8   :  { %v541_v41 = vmul.f32 0.25, %v125_v40 }
  0xaa   :  { %v127_v42 = vand.u32 2147483647, %v541_v41  ;;  %v437_v43 = vadd.f32 -1.0, %v541_v41  ;;  %v438_v44 = vadd.f32 -2.0, %v541_v41  ;;  %v444_v45 = vadd.f32 -8.0, %v541_v41 }
  0xab   :  { %v443_v46 = vadd.f32 -7.0, %v541_v41  ;;  %v439_v56 = vadd.f32 -3.0, %v541_v41  ;;  %v447_v61 = vadd.f32 -11.0, %v541_v41  ;;  %v446_v62 = vadd.f32 -10.0, %v541_v41 }
  0xac   :  { %v128_v47 = vsub.f32 1.0, %v127_v42  ;;  %v141_v48 = vand.u32 2147483647, %v437_v43  ;;  %v155_v49 = vand.u32 2147483647, %v438_v44  ;;  %v449_v5 = vadd.f32 -13.0, %v541_v41 }
  0xad   :  { %v239_v54 = vand.u32 2147483647, %v444_v45  ;;  %v225_v55 = vand.u32 2147483647, %v443_v46  ;;  %v169_v4 = vand.u32 2147483647, %v439_v56 }
  0xae   :  { %v129_v52 = vmax.f32 %v128_v47, 0.0  ;;  %v550_v53 = vsub.f32 1.0, %v141_v48  ;;  %v156_v60 = vsub.f32 1.0, %v155_v49  ;;  %v281_v6 = vand.u32 2147483647, %v447_v61 }
  0xaf   :  { %v240_v1 = vsub.f32 1.0, %v239_v54  ;;  %v226_v2 = vsub.f32 1.0, %v225_v55  ;;  %v267_v7 = vand.u32 2147483647, %v446_v62  ;;  %v309_v10 = vand.u32 2147483647, %v449_v5 }
  0xb0   :  { %v134_v57 = vsel %vm48_vm12, %v129_v52, 0.0  ;;  %v143_v58 = vmax.f32 %v550_v53, 0.0  ;;  %v130_v59 = vmul.f32 %v129_v52, %v548_v51  ;;  %v157_v3 = vmax.f32 %v156_v60, 0.0 }
  0xb1   :  { %135 = vadd.xlane.f32.xlu1 %v134_v57  ;;  %v241_v8 = vmax.f32 %v240_v1, 0.0  ;;  %v227_v9 = vmax.f32 %v226_v2, 0.0  ;;  %v170_v12 = vsub.f32 1.0, %v169_v4  ;;  %v440_v13 = vadd.f32 -4.0, %v541_v41 }
  0xb2   :  { %v148_v63 = vsel %vm48_vm12, %v143_v58, 0.0  ;;  %v131_v0 = vsel %vm48_vm12, %v130_v59, 0.0  ;;  %v162_v11 = vsel %vm48_vm12, %v157_v3, 0.0  ;;  %v282_v14 = vsub.f32 1.0, %v281_v6 }
  0xb3   :  { %149 = vadd.xlane.f32.xlu2 %v148_v63  ;;  %132 = vadd.xlane.f32.xlu0 %v131_v0  ;;  %v268_v15 = vsub.f32 1.0, %v267_v7  ;;  %v246_v16 = vsel %vm48_vm12, %v241_v8, 0.0  ;;  %v232_v17 = vsel %vm48_vm12, %v227_v9, 0.0  ;;  %v310_v18 = vsub.f32 1.0, %v309_v10 }
  0xb4   :  { %v171_v19 = vmax.f32 %v170_v12, 0.0  ;;  %v183_v20 = vand.u32 2147483647, %v440_v13  ;;  %v283_v21 = vmax.f32 %v282_v14, 0.0  ;;  %v445_v24 = vadd.f32 -9.0, %v541_v41 }
  0xb5   :  { %v269_v22 = vmax.f32 %v268_v15, 0.0  ;;  %v311_v23 = vmax.f32 %v310_v18, 0.0  ;;  %v228_v25 = vmul.f32 %v227_v9, %v548_v51  ;;  %v242_v26 = vmul.f32 %v241_v8, %v548_v51 }
  0xb6   :  { %v176_v27 = vsel %vm48_vm12, %v171_v19, 0.0  ;;  %v184_v28 = vsub.f32 1.0, %v183_v20  ;;  %v441_v29 = vadd.f32 -5.0, %v541_v41  ;;  %v288_v30 = vsel %vm48_vm12, %v283_v21, 0.0 }
  0xb7   :  { %v574_v31 = vsel %vm48_vm12, %v228_v25, 0.0  ;;  %v577_v32 = vsel %vm48_vm12, %v242_v26, 0.0  ;;  %v270_v33 = vmul.f32 %v269_v22, %v548_v51  ;;  %v274_v34 = vsel %vm48_vm12, %v269_v22, 0.0 }
  0xb8   :  { %v253_v35 = vand.u32 2147483647, %v445_v24  ;;  %v284_v36 = vmul.f32 %v283_v21, %v548_v51  ;;  %v312_v37 = vmul.f32 %v311_v23, %v548_v51  ;;  %v450_v39 = vadd.f32 -14.0, %v541_v41 }
  0xb9   :  { %163 = vadd.xlane.f32.xlu1 %v162_v11  ;;  %v584_v38 = vsel %vm48_vm12, %v270_v33, 0.0  ;;  %v185_v40 = vmax.f32 %v184_v28, 0.0  ;;  %v197_v42 = vand.u32 2147483647, %v441_v29  ;;  %v158_v46 = vmul.f32 %v157_v3, %v548_v51 }
  0xba   :  { %v588_v43 = vsel %vm48_vm12, %v284_v36, 0.0  ;;  %v591_v44 = vsel %vm48_vm12, %v312_v37, 0.0  ;;  %v323_v45 = vand.u32 2147483647, %v450_v39  ;;  %v254_v47 = vsub.f32 1.0, %v253_v35 }
  0xbb   :  { %247 = vadd.xlane.f32.xlu2 %v246_v16  ;;  %233 = vadd.xlane.f32.xlu0 %v232_v17  ;;  %v448_v48 = vadd.f32 -12.0, %v541_v41  ;;  %v597_v49 = vsel %vm48_vm12, %v548_v51, 0.0  ;;  %v190_v52 = vsel %vm48_vm12, %v185_v40, 0.0  ;;  %v198_v54 = vsub.f32 1.0, %v197_v42 }
  0xbc   :  { %v324_v50 = vsub.f32 1.0, %v323_v45  ;;  %v442_v55 = vadd.f32 -6.0, %v541_v41  ;;  %v159_v57 = vsel %vm48_vm12, %v158_v46, 0.0  ;;  %v316_v59 = vsel %vm48_vm12, %v311_v23, 0.0 }
  0xbd   :  { %v255_v60 = vmax.f32 %v254_v47, 0.0  ;;  %v295_v61 = vand.u32 2147483647, %v448_v48  ;;  %v199_v0 = vmax.f32 %v198_v54, 0.0  ;;  %v172_v3 = vmul.f32 %v171_v19, %v548_v51 }
  0xbe   :  { %v325_v56 = vmax.f32 %v324_v50, 0.0  ;;  %v211_v1 = vand.u32 2147483647, %v442_v55  ;;  %v451_v6 = vadd.f32 -15.0, %v541_v41  ;;  %v186_v14 = vmul.f32 %v185_v40, %v548_v51 }
  0xbf   :  { %v256_v4 = vmul.f32 %v255_v60, %v548_v51  ;;  %v296_v5 = vsub.f32 1.0, %v295_v61  ;;  %v204_v7 = vsel %vm48_vm12, %v199_v0, 0.0  ;;  %v173_v9 = vsel %vm48_vm12, %v172_v3, 0.0 }
  0xc0   :  { %v326_v62 = vmul.f32 %v325_v56, %v548_v51  ;;  %v330_v63 = vsel %vm48_vm12, %v325_v56, 0.0  ;;  %v212_v8 = vsub.f32 1.0, %v211_v1  ;;  %v337_v12 = vand.u32 2147483647, %v451_v6 }
  0xc1   :  { %177 = vadd.xlane.f32.xlu1 %v176_v27  ;;  %v257_v10 = vsel %vm48_vm12, %v256_v4, 0.0  ;;  %v297_v11 = vmax.f32 %v296_v5, 0.0  ;;  %v187_v17 = vsel %vm48_vm12, %v186_v14, 0.0  ;;  %v200_v20 = vmul.f32 %v199_v0, %v548_v51 }
  0xc2   :  { %v327_v2 = vsel %vm48_vm12, %v326_v62, 0.0  ;;  %v213_v13 = vmax.f32 %v212_v8, 0.0  ;;  %v338_v16 = vsub.f32 1.0, %v337_v12  ;;  %v260_v22 = vsel %vm48_vm12, %v255_v60, 0.0 }
  0xc3   :  { %289 = vadd.xlane.f32.xlu2 %v288_v30  ;;  %275 = vadd.xlane.f32.xlu0 %v274_v34  ;;  %v298_v15 = vmul.f32 %v297_v11, %v548_v51  ;;  %v201_v23 = vsel %vm48_vm12, %v200_v20, 0.0  ;;  %v302_v26 = vsel %vm48_vm12, %v297_v11, 0.0  ;;  %v144_v28 = vmul.f32 %v143_v58, %v548_v51 }
  0xc4   :  { %v218_v41 = vsel %vm48_vm12, %v213_v13, 0.0  ;;  %v339_v19 = vmax.f32 %v338_v16, 0.0  ;;  %v214_v25 = vmul.f32 %v213_v13, %v548_v51 }
  0xc5   :  { %v299_v18 = vsel %vm48_vm12, %v298_v15, 0.0  ;;  %v145_v29 = vsel %vm48_vm12, %v144_v28, 0.0 }
  0xc6   :  { %v340_v21 = vmul.f32 %v339_v19, %v548_v51  ;;  %v215_v27 = vsel %vm48_vm12, %v214_v25, 0.0  ;;  %v344_v30 = vsel %vm48_vm12, %v339_v19, 0.0 }
  0xc8   :  { %v341_v24 = vsel %vm48_vm12, %v340_v21, 0.0  ;;  %vm347_vm12 = vcmask 130168  }
  0xc9   :  { %191 = vadd.xlane.f32.xlu1 %v190_v52 }
  0xcb   :  { %160 = vadd.xlane.f32.xlu2 %v159_v57  ;;  %317 = vadd.xlane.f32.xlu0 %v316_v59 }
  0xd1   :  { %205 = vadd.xlane.f32.xlu1 %v204_v7 }
  0xd3   :  { %174 = vadd.xlane.f32.xlu2 %v173_v9  ;;  %258 = vadd.xlane.f32.xlu0 %v257_v10 }
  0xd9   :  { %219 = vadd.xlane.f32.xlu1 %v218_v41 }
  0xdb   :  { %188 = vadd.xlane.f32.xlu2 %v187_v17  ;;  %300 = vadd.xlane.f32.xlu0 %v299_v18 }
  0xe1   :  { %261 = vadd.xlane.f32.xlu1 %v260_v22 }
  0xe3   :  { %202 = vadd.xlane.f32.xlu2 %v201_v23  ;;  %342 = vadd.xlane.f32.xlu0 %v341_v24 }
  0xe9   :  { %303 = vadd.xlane.f32.xlu1 %v302_v26 }
  0xeb   :  { %216 = vadd.xlane.f32.xlu2 %v215_v27 }
  0xf1   :  { %146 = vadd.xlane.f32.xlu1 %v145_v29 }
  0xf3   :  { %230 = vadd.xlane.f32.xlu2 %v574_v31 }
  0xf9   :  { %244 = vadd.xlane.f32.xlu1 %v577_v32 }
  0xfb   :  { %272 = vadd.xlane.f32.xlu2 %v584_v38 }
 0x101   :  { %286 = vadd.xlane.f32.xlu1 %v588_v43 }
 0x103   :  { %314 = vadd.xlane.f32.xlu2 %v591_v44 }
 0x109   :  { %328 = vadd.xlane.f32.xlu1 %v327_v2 }
 0x10b   :  { %331 = vadd.xlane.f32.xlu2 %v330_v63 }
 0x111   :  { %345 = vadd.xlane.f32.xlu1 %v344_v30 }
 0x119   :  { %50 = vadd.xlane.f32.xlu1 %v597_v49 }
 0x124   :  { %v136_v51 = vpop.xlane.xlu1 %135 }
 0x125   :  { %139 = vst.msk [vmem:[#allocation3] sm:$0xff] %vm137_vm13, %v136_v51 }
 0x126   :  { %v150_v53 = vpop.xlane.xlu2 %149  ;;  %v133_v58 = vpop.xlane.xlu0 %132 }
 0x127   :  { %153 = vst.msk [vmem:[#allocation3] sm:$0xff] %vm151_vm14, %v150_v53 }
 0x128   :  { %138 = vst.msk [vmem:[#allocation2] sm:$0xff] %vm137_vm13, %v133_v58 }
 0x12c   :  { %v164_v31 = vpop.xlane.xlu1 %163 }
 0x12d   :  { %167 = vst.msk [vmem:[#allocation3] sm:$0xff] %vm165_vm15, %v164_v31 }
 0x12e   :  { %v248_v32 = vpop.xlane.xlu2 %247  ;;  %v234_v39 = vpop.xlane.xlu0 %233 }
 0x134   :  { %v178_v33 = vpop.xlane.xlu1 %177 }
 0x135   :  { %181 = vst.msk [vmem:[#allocation3] sm:$0xff] %vm179_vm0, %v178_v33 }
 0x136   :  { %v290_v34 = vpop.xlane.xlu2 %289  ;;  %v276_v43 = vpop.xlane.xlu0 %275 }
 0x13c   :  { %v192_v35 = vpop.xlane.xlu1 %191 }
 0x13d   :  { %195 = vst.msk [vmem:[#allocation3] sm:$0xff] %vm193_vm1, %v192_v35 }
 0x13e   :  { %v161_v36 = vpop.xlane.xlu2 %160  ;;  %v318_v47 = vpop.xlane.xlu0 %317 }
 0x144   :  { %v206_v37 = vpop.xlane.xlu1 %205 }
 0x145   :  { %209 = vst.msk [vmem:[#allocation3] sm:$0xff] %vm207_vm2, %v206_v37 }
 0x146   :  { %v175_v38 = vpop.xlane.xlu2 %174  ;;  %v259_v52 = vpop.xlane.xlu0 %258 }
 0x14c   :  { %v220_v40 = vpop.xlane.xlu1 %219 }
 0x14d   :  { %223 = vst.msk [vmem:[#allocation3] sm:$0xff] %vm221_vm3, %v220_v40 }
 0x14e   :  { %237 = vst.msk [vmem:[#allocation3] sm:$0xff] %vm235_vm4, %v234_v39  ;;  %v189_v42 = vpop.xlane.xlu2 %188  ;;  %v301_v56 = vpop.xlane.xlu0 %300 }
 0x14f   :  { %251 = vst.msk [vmem:[#allocation3] sm:$0xff] %vm249_vm5, %v248_v32 }
 0x154   :  { %v262_v44 = vpop.xlane.xlu1 %261 }
 0x155   :  { %265 = vst.msk [vmem:[#allocation3] sm:$0xff] %vm263_vm6, %v262_v44 }
 0x156   :  { %279 = vst.msk [vmem:[#allocation3] sm:$0xff] %vm277_vm7, %v276_v43  ;;  %v203_v45 = vpop.xlane.xlu2 %202  ;;  %v343_v61 = vpop.xlane.xlu0 %342 }
 0x157   :  { %293 = vst.msk [vmem:[#allocation3] sm:$0xff] %vm291_vm8, %v290_v34 }
 0x15c   :  { %v304_v46 = vpop.xlane.xlu1 %303 }
 0x15d   :  { %307 = vst.msk [vmem:[#allocation3] sm:$0xff] %vm305_vm9, %v304_v46 }
 0x15e   :  { %v217_v48 = vpop.xlane.xlu2 %216  ;;  %321 = vst.msk [vmem:[#allocation3] sm:$0xff] %vm319_vm10, %v318_v47 }
 0x164   :  { %v147_v49 = vpop.xlane.xlu1 %146 }
 0x165   :  { %152 = vst.msk [vmem:[#allocation2] sm:$0xff] %vm151_vm14, %v147_v49  ;;  %vm353_vm14 = vcmask 130048  }
 0x166   :  { %166 = vst.msk [vmem:[#allocation2] sm:$0xff] %vm165_vm15, %v161_v36  ;;  %v231_v50 = vpop.xlane.xlu2 %230 }
 0x167   :  { %180 = vst.msk [vmem:[#allocation2] sm:$0xff] %vm179_vm0, %v175_v38 }
 0x168   :  { %194 = vst.msk [vmem:[#allocation2] sm:$0xff] %vm193_vm1, %v189_v42 }
 0x169   :  { %208 = vst.msk [vmem:[#allocation2] sm:$0xff] %vm207_vm2, %v203_v45 }
 0x16a   :  { %222 = vst.msk [vmem:[#allocation2] sm:$0xff] %vm221_vm3, %v217_v48 }
 0x16b   :  { %236 = vst.msk [vmem:[#allocation2] sm:$0xff] %vm235_vm4, %v231_v50 }
 0x16c   :  { %v245_v54 = vpop.xlane.xlu1 %244 }
 0x16d   :  { %250 = vst.msk [vmem:[#allocation2] sm:$0xff] %vm249_vm5, %v245_v54 }
 0x16e   :  { %264 = vst.msk [vmem:[#allocation2] sm:$0xff] %vm263_vm6, %v259_v52  ;;  %v273_v55 = vpop.xlane.xlu2 %272 }
 0x16f   :  { %278 = vst.msk [vmem:[#allocation2] sm:$0xff] %vm277_vm7, %v273_v55 }
 0x174   :  { %v287_v57 = vpop.xlane.xlu1 %286 }
 0x175   :  { %292 = vst.msk [vmem:[#allocation2] sm:$0xff] %vm291_vm8, %v287_v57 }
 0x176   :  { %306 = vst.msk [vmem:[#allocation2] sm:$0xff] %vm305_vm9, %v301_v56  ;;  %v315_v59 = vpop.xlane.xlu2 %314 }
 0x177   :  { %320 = vst.msk [vmem:[#allocation2] sm:$0xff] %vm319_vm10, %v315_v59 }
 0x17c   :  { %v329_v60 = vpop.xlane.xlu1 %328 }
 0x17d   :  { %334 = vst.msk [vmem:[#allocation2] sm:$0xff] %vm333_vm11, %v329_v60 }
 0x17e   :  { %348 = vst.msk [vmem:[#allocation2] sm:$0xff] %vm347_vm12, %v343_v61  ;;  %v332_v62 = vpop.xlane.xlu2 %331 }
 0x17f   :  { %335 = vst.msk [vmem:[#allocation3] sm:$0xff] %vm333_vm11, %v332_v62 }
 0x184   :  { %v346_v63 = vpop.xlane.xlu1 %345 }
 0x185   :  { %349 = vst.msk [vmem:[#allocation3] sm:$0xff] %vm347_vm12, %v346_v63  ;;  %v350_v0 = vld [vmem:[#allocation2] sm:$0xff] }
 0x186   :  { %v354_v1 = vsel %vm353_vm14, %v350_v0, 0.0 }
 0x187   :  { %355 = vadd.xlane.f32.xlu2 %v354_v1 }
 0x18c   :  { %v351_v2 = vld [vmem:[#allocation3] sm:$0xff]  ;;  %v51_v44 = vpop.xlane.xlu1 %50 }
 0x18d   :  { %v352_v3 = vsub.f32 %v351_v2, %v350_v0  ;;  %v396_v4 = vmul.f32 0.14285715, %v351_v2  ;;  %v52_v46 = vmul.f32 0.14285715, %v51_v44 }
 0x18f   :  { %v357_v5 = vsel %vm353_vm14, %v352_v3, 0.0  ;;  %v397_v6 = vadd.f32 1e-07, %v396_v4  ;;  %v53_v49 = vsub.f32 1.0, %v52_v46 }
 0x190   :  { %358 = vadd.xlane.f32.xlu0 %v357_v5 }
 0x191   :  { %465 = vlog2.f32 %v397_v6 }
 0x197   :  { %v466_v7 = vpop.eup %465 }
 0x198   :  { %v399_v8 = vmul.f32 0.6931472, %v466_v7 }
 0x19a   :  { %v400_v9 = vmul.f32 %v399_v8, %v396_v4 }
 0x19c   :  { %v401_v10 = vsel %vm353_vm14, %v400_v9, 0.0 }
 0x19d   :  { %402 = vadd.xlane.f32.xlu1 %v401_v10 }
 0x1fa   :  { %v356_v11 = vpop.xlane.xlu2 %355 }
 0x1fb   :  { %vm360_vm15 = vcmp.gt.f32.partialorder %v356_v11, 0.0 }
 0x1fc   :  { %v361_v12 = vsel %vm360_vm15, %v356_v11, 1.0 }
 0x1fd   :  { %467 = vrcp.f32 %v361_v12  ;;  %v373_v17 = vand.u32 2147483648, %v361_v12  ;;  %v371_v19 = vand.u32 2147483647, %v361_v12  ;;  %vm367_vm2 = vweird.f32 %v361_v12 }
 0x1ff   :  { %v374_v21 = vor.u32 1.1754944e-38, %v373_v17  ;;  %vm372_vm4 = vcmp.eq.f32.partialorder %v371_v19, 8.507059e+37 }
 0x203   :  { %v468_v13 = vpop.eup %467  ;;  %v359_v14 = vpop.xlane.xlu0 %358 }
 0x204   :  { %v363_v15 = vmul.f32 %v468_v13, %v361_v12  ;;  %vm378_vm0 = vcmp.gt.f32.partialorder %v359_v14, 0.0  ;;  %vm368_vm1 = vweird.f32 %v468_v13 }
 0x205   :  { %v379_v16 = vsel %vm378_vm0, %v359_v14, 1.0  ;;  %vm369_vm3 = vmor %vm367_vm2, %vm368_vm1 }
 0x206   :  { %v364_v41 = vsub.f32 1.0, %v363_v15  ;;  %469 = vrcp.f32 %v379_v16  ;;  %v391_v28 = vand.u32 2147483648, %v379_v16  ;;  %v389_v51 = vand.u32 2147483647, %v379_v16 }
 0x207   :  { %vm385_vm6 = vweird.f32 %v379_v16 }
 0x208   :  { %v365_v18 = vmul.f32 %v468_v13, %v364_v41  ;;  %v392_v58 = vor.u32 1.1754944e-38, %v391_v28  ;;  %vm390_vm8 = vcmp.eq.f32.partialorder %v389_v51, 8.507059e+37 }
 0x20a   :  { %v366_v20 = vadd.f32 %v468_v13, %v365_v18 }
 0x20c   :  { %v470_v22 = vpop.eup %469  ;;  %v370_v23 = vsel %vm369_vm3, %v468_v13, %v366_v20 }
 0x20d   :  { %v381_v24 = vmul.f32 %v470_v22, %v379_v16  ;;  %v375_v25 = vsel %vm372_vm4, %v374_v21, %v370_v23  ;;  %vm386_vm5 = vweird.f32 %v470_v22 }
 0x20e   :  { %v377_v26 = vmul.f32 %v375_v25, %v350_v0  ;;  %vm387_vm7 = vmor %vm385_vm6, %vm386_vm5 }
 0x20f   :  { %v382_v27 = vsub.f32 1.0, %v381_v24 }
 0x210   :  { %v405_v29 = vadd.f32 1e-07, %v377_v26  ;;  %v403_v52 = vpop.xlane.xlu1 %402 }
 0x211   :  { %v383_v30 = vmul.f32 %v470_v22, %v382_v27  ;;  %v404_v56 = vsub.f32 0.0, %v403_v52 }
 0x212   :  { %471 = vlog2.f32 %v405_v29 }
 0x213   :  { %v384_v53 = vadd.f32 %v470_v22, %v383_v30 }
 0x215   :  { %v388_v31 = vsel %vm387_vm7, %v470_v22, %v384_v53 }
 0x216   :  { %v393_v32 = vsel %vm390_vm8, %v392_v58, %v388_v31 }
 0x217   :  { %v395_v33 = vmul.f32 %v393_v32, %v352_v3 }
 0x218   :  { %v472_v34 = vpop.eup %471 }
 0x219   :  { %v407_v35 = vmul.f32 0.6931472, %v472_v34  ;;  %v413_v36 = vadd.f32 1e-07, %v395_v33 }
 0x21b   :  { %v408_v37 = vmul.f32 %v407_v35, %v377_v26  ;;  %473 = vlog2.f32 %v413_v36 }
 0x21d   :  { %v409_v38 = vsel %vm353_vm14, %v408_v37, 0.0 }
 0x21e   :  { %410 = vadd.xlane.f32.xlu2 %v409_v38 }
 0x221   :  { %v474_v39 = vpop.eup %473 }
 0x222   :  { %v415_v40 = vmul.f32 0.6931472, %v474_v39 }
 0x224   :  { %v416_v42 = vmul.f32 %v415_v40, %v395_v33 }
 0x226   :  { %v417_v43 = vsel %vm353_vm14, %v416_v42, 0.0 }
 0x227   :  { %418 = vadd.xlane.f32.xlu0 %v417_v43 }
 0x291   :  { %v411_v45 = vpop.xlane.xlu2 %410 }
 0x292   :  { %v412_v47 = vsub.f32 0.0, %v411_v45 }
 0x294   :  { %v421_v54 = vmul.f32 %v412_v47, %v52_v46 }
 0x29a   :  { %v419_v48 = vpop.xlane.xlu0 %418 }
 0x29b   :  { %v420_v50 = vsub.f32 0.0, %v419_v48 }
 0x29d   :  { %v422_v55 = vmul.f32 %v420_v50, %v53_v49 }
 0x29f   :  { %v423_v57 = vadd.f32 %v422_v55, %v421_v54 }
 0x2a1   :  { %v424_v59 = vsub.f32 %v404_v56, %v423_v57 }
 0x2a3   :  { %425 = vst.msk [vmem:[%s677_s4] sm:$0xff] %vm137_vm13, %v424_v59 }
 0x2a4   :  { %430 = vsyncpa [#allocation5], 1 }

</bundles_post_ra>
